<compile_context>
chip_gen: v7x
topology: tpu7x:2x2x1
jax: 0.10.0
libtpu: 0.0.40
codegen_flags: <defaults>
</compile_context>

<pallas_src>
import functools

import jax
import jax.numpy as jnp
from jax.experimental import pallas as pl
from jax.experimental.pallas import tpu as pltpu


# ----------------------------------------------------------------------------- kernels
def _pass1_kernel(x_ref, w_ref, ba_ref, bv_ref, g_ref, vsm_ref,
                  m_sc, s_sc, acc_sc, *, c_m, c_n, n_total, need_mask):
    """Pass 1: fused A|B|V projection, online softmax_L(B) -> G, softmax_cn(V) -> HBM."""
    ki = pl.program_id(1)
    ti = pl.program_id(2)

    @pl.when((ki == 0) & (ti == 0))
    def _():
        m_sc[...] = jnp.full_like(m_sc, -jnp.inf)
        s_sc[...] = jnp.zeros_like(s_sc)
        acc_sc[...] = jnp.zeros_like(acc_sc)

    x = x_ref[0].astype(w_ref.dtype)                                   # (C, tn) bf16/f32
    # one fused MXU pass: (c_m + 2*c_n, C) @ (C, tn)
    proj = jnp.dot(w_ref[...], x, preferred_element_type=jnp.float32)  # (c_m+2c_n, tn)
    a = proj[:c_m]                                  # (c_m, tn)  (ba folded into G later)
    bsc = proj[c_m:c_m + c_n]                       # (c_n, tn)  (bb cancels in softmax_L)
    v = proj[c_m + c_n:] + bv_ref[...]              # (c_n, tn)

    if need_mask:                                   # partial last tile along N
        tn = x_ref.shape[-1]
        col = ti * tn + jax.lax.broadcasted_iota(jnp.int32, (1, tn), 1)
        valid = col < n_total
        a = jnp.where(valid, a, 0.0)
        bsc = jnp.where(valid, bsc, -jnp.inf)

    # flash-style online max / sum over L for softmaxB, normalization deferred into G
    m_new = jnp.maximum(m_sc[...], jnp.max(bsc, axis=1, keepdims=True))   # (c_n, 1)
    scale = jnp.exp(m_sc[...] - m_new)                                    # (c_n, 1)
    eb = jnp.exp(bsc - m_new)                                             # (c_n, tn)
    s_sc[...] = s_sc[...] * scale + jnp.sum(eb, axis=1, keepdims=True)
    acc_sc[...] = acc_sc[...] * scale.T + jax.lax.dot_general(
        a.astype(w_ref.dtype), eb.astype(w_ref.dtype),                    # bf16 MXU ops
        (((1,), (1,)), ((), ())), preferred_element_type=jnp.float32)     # (c_m, c_n)
    m_sc[...] = m_new

    # softmax over c_n (sublane axis) for V, stored lane-dense so pass 2 skips x
    v = v - jnp.max(v, axis=0, keepdims=True)
    ev = jnp.exp(v)
    inv = pl.reciprocal(jnp.sum(ev, axis=0, keepdims=True), approx=True)  # (1, tn) EUP
    vsm_ref[0] = (ev * inv).astype(vsm_ref.dtype)

    @pl.when((ki == pl.num_programs(1) - 1) & (ti == pl.num_programs(2) - 1))
    def _():
        inv_s = pl.reciprocal(s_sc[...], approx=True)                     # (c_n, 1) EUP
        # ba folds exactly into G because softmaxB columns sum to 1.
        g_ref[0] = (acc_sc[...] * inv_s.T + ba_ref[...]).astype(g_ref.dtype)


def _pass2_kernel(g_ref, vsm_ref, o_ref):
    """Pass 2: Z[:, tile] = G @ softmax_cn(V)[:, tile], lane-dense over L."""
    g = g_ref[0].astype(vsm_ref.dtype)                                    # (c_m, c_n)
    z = jnp.dot(g, vsm_ref[0], preferred_element_type=jnp.float32)       # (c_m, tn)
    o_ref[0] = z.astype(o_ref.dtype)


# ----------------------------------------------------------------------------- wrapper
def _vmem_capacity_bytes():
    try:
        info = pltpu.get_tpu_info()
        cap = int(getattr(info, "vmem_capacity_bytes", 0))
        if cap > 0:
            return cap
    except Exception:
        pass
    return 64 << 20     # conservative default (v7x per-TC VMEM)


def _pick_n_tile(N, C, c_m, c_n, vsm_bytes, vmem_limit):
    """Largest lane-dense tile whose per-pass double-buffered blocks fit comfortably."""
    per_col = max(2 * (C * 4 + c_n * vsm_bytes),       # pass 1: x f32 dbl-buf + V_sm out
                  2 * (c_n * vsm_bytes + c_m * 4))     # pass 2: V_sm in + Z out
    cap = max(128, (vmem_limit // 2) // max(per_col, 1))
    cap = min(max(128, cap - cap % 128), 4096)
    if N <= cap:
        return N                                       # single block (== full dim, legal)
    t = cap
    while t >= 128:                                    # prefer an exact divisor of N
        if N % t == 0:
            return t
        t -= 128
    return cap                                         # cdiv grid + masked last tile


def double_attention(x, wa, ba, wb, bb, wv, bv, *, c_m, c_n, K=1,
                     l_tile=None, mxu_dtype=jnp.bfloat16):
    """x: (b, C, d, h, w) float32; weights w*: (c_out, C); biases b*: (c_out,)."""
    del bb  # exact no-op: constant along the softmax-over-L axis, cancels in softmaxB
    b, C, d, h, w = x.shape
    assert b % K == 0
    batch = b // K
    N = d * h * w
    vsm_bytes = jnp.dtype(mxu_dtype).itemsize

    vmem_cap = _vmem_capacity_bytes()
    vmem_limit = int(max(min(vmem_cap * 3 // 4, 96 << 20), 32 << 20))

    tn = l_tile if l_tile is not None else _pick_n_tile(N, C, c_m, c_n, vsm_bytes,
                                                        vmem_limit)
    n_nt = pl.cdiv(N, tn)
    need_mask = (N % tn) != 0

    # channels-major view: pure reshape of contiguous NCDHW, no HBM copy
    xg = x.reshape(b, C, N)

    c_tot = c_m + 2 * c_n
    w_all = jnp.concatenate([wa, wb, wv], axis=0).astype(mxu_dtype)   # (c_m+2c_n, C)
    ba2 = ba.reshape(c_m, 1).astype(jnp.float32)
    bv2 = bv.reshape(c_n, 1).astype(jnp.float32)

    # --- pass 1: G (per group) + softmax_cn(V) (per sample), x read exactly once
    g, vsm = pl.pallas_call(
        functools.partial(_pass1_kernel, c_m=c_m, c_n=c_n,
                          n_total=N, need_mask=need_mask),
        out_shape=(jax.ShapeDtypeStruct((batch, c_m, c_n), jnp.float32),
                   jax.ShapeDtypeStruct((b, c_n, N), mxu_dtype)),
        grid=(batch, K, n_nt),
        in_specs=[
            pl.BlockSpec((1, C, tn), lambda gi, ki, ti: (gi * K + ki, 0, ti)),
            pl.BlockSpec((c_tot, C), lambda gi, ki, ti: (0, 0)),
            pl.BlockSpec((c_m, 1), lambda gi, ki, ti: (0, 0)),
            pl.BlockSpec((c_n, 1), lambda gi, ki, ti: (0, 0)),
        ],
        out_specs=(
            pl.BlockSpec((1, c_m, c_n), lambda gi, ki, ti: (gi, 0, 0)),
            pl.BlockSpec((1, c_n, tn), lambda gi, ki, ti: (gi * K + ki, 0, ti)),
        ),
        scratch_shapes=[
            pltpu.VMEM((c_n, 1), jnp.float32),     # running max over L
            pltpu.VMEM((c_n, 1), jnp.float32),     # running colsum over L
            pltpu.VMEM((c_m, c_n), jnp.float32),   # G accumulator
        ],
        compiler_params=pltpu.CompilerParams(
            dimension_semantics=("parallel", "arbitrary", "arbitrary"),
            vmem_limit_bytes=vmem_limit),
    )(xg, w_all, ba2, bv2)

    # --- pass 2: Z[:, tile] = G @ V_sm[:, tile]; never re-reads x
    out = pl.pallas_call(
        _pass2_kernel,
        out_shape=jax.ShapeDtypeStruct((b, c_m, N), x.dtype),
        grid=(b, n_nt),
        in_specs=[
            pl.BlockSpec((1, c_m, c_n), lambda bi, ti: (bi // K, 0, 0)),
            pl.BlockSpec((1, c_n, tn), lambda bi, ti: (bi, 0, ti)),
        ],
        out_specs=pl.BlockSpec((1, c_m, tn), lambda bi, ti: (bi, 0, ti)),
        compiler_params=pltpu.CompilerParams(
            dimension_semantics=("parallel", "parallel"),
            vmem_limit_bytes=vmem_limit),
    )(g, vsm)

    return out.reshape(b, c_m, d, h, w)


# ----------------------------------------------------------------------------- reference
def _reference(x, wa, ba, wb, bb, wv, bv, *, c_m, c_n, K=1):
    """Pure-JAX reference mirroring the PyTorch forward exactly (f32)."""
    b, C, d, h, w = x.shape
    batch = b // K
    N = d * h * w
    A = jnp.einsum('bcn,mc->bmn', x.reshape(b, C, N), wa) + ba[None, :, None]
    B = jnp.einsum('bcn,mc->bmn', x.reshape(b, C, N), wb) + bb[None, :, None]
    V = jnp.einsum('bcn,mc->bmn', x.reshape(b, C, N), wv) + bv[None, :, None]
    tmpA = A.reshape(batch, K, c_m, N).transpose(0, 2, 1, 3).reshape(batch, c_m, K * N)
    tmpB = B.reshape(batch, K, c_n, N).transpose(0, 2, 1, 3).reshape(batch * c_n, K * N)
    tmpV = V.reshape(batch, K, c_n, N).transpose(0, 1, 3, 2).reshape(b * N, c_n)
    smB = jax.nn.softmax(tmpB, axis=1).reshape(batch, c_n, K * N).transpose(0, 2, 1)
    smV = jax.nn.softmax(tmpV, axis=1).reshape(batch, K * N, c_n).transpose(0, 2, 1)
    tmpG = jnp.matmul(tmpA, smB)
    tmpZ = jnp.matmul(tmpG, smV)
    return tmpZ.reshape(batch, c_m, K, N).transpose(0, 2, 1, 3).reshape(b, c_m, d, h, w)


if __name__ == "__main__":
    key = jax.random.PRNGKey(0)
    kx, kwa, kba, kwb, kbb, kwv, kbv, kx2 = jax.random.split(key, 8)

    b, C, d, h, w = 2, 8, 4, 8, 8            # N = 256
    c_m, c_n = 8, 8
    x = jax.random.normal(kx, (b, C, d, h, w), dtype=jnp.float32)
    wa = jax.random.normal(kwa, (c_m, C), dtype=jnp.float32) * 0.5
    ba = jax.random.normal(kba, (c_m,), dtype=jnp.float32) * 0.1
    wb = jax.random.normal(kwb, (c_n, C), dtype=jnp.float32) * 0.5
    bb = jax.random.normal(kbb, (c_n,), dtype=jnp.float32) * 0.1
    wv = jax.random.normal(kwv, (c_n, C), dtype=jnp.float32) * 0.5
    bv = jax.random.normal(kbv, (c_n,), dtype=jnp.float32) * 0.1

    # 1) bf16 fast path, K=1, L tiled into 2 blocks (exercises the online softmax)
    z_ref = _reference(x, wa, ba, wb, bb, wv, bv, c_m=c_m, c_n=c_n, K=1)
    z = jax.block_until_ready(double_attention(x, wa, ba, wb, bb, wv, bv,
                                               c_m=c_m, c_n=c_n, K=1, l_tile=128))
    assert z.shape == (b, c_m, d, h, w)
    assert jnp.allclose(z, z_ref, atol=5e-2, rtol=5e-2), "bf16 K=1 mismatch"

    # 2) f32 parity path, auto tile size (single block per sample)
    z = jax.block_until_ready(double_attention(x, wa, ba, wb, bb, wv, bv,
                                               c_m=c_m, c_n=c_n, K=1,
                                               mxu_dtype=jnp.float32))
    assert jnp.allclose(z, z_ref, atol=1e-2, rtol=1e-2), "f32 K=1 mismatch"

    # 3) bf16, K=2 (both samples share one attention group; exercises the K reduction)
    z_ref2 = _reference(x, wa, ba, wb, bb, wv, bv, c_m=c_m, c_n=c_n, K=2)
    z = jax.block_until_ready(double_attention(x, wa, ba, wb, bb, wv, bv,
                                               c_m=c_m, c_n=c_n, K=2, l_tile=128))
    assert jnp.allclose(z, z_ref2, atol=5e-2, rtol=5e-2), "bf16 K=2 mismatch"

    # 4) bf16, N=192 with a 128 tile (exercises the masked / partial last tile path)
    x2 = jax.random.normal(kx2, (b, C, 3, 8, 8), dtype=jnp.float32)
    z_ref3 = _reference(x2, wa, ba, wb, bb, wv, bv, c_m=c_m, c_n=c_n, K=1)
    z = jax.block_until_ready(double_attention(x2, wa, ba, wb, bb, wv, bv,
                                               c_m=c_m, c_n=c_n, K=1, l_tile=128))
    assert jnp.allclose(z, z_ref3, atol=5e-2, rtol=5e-2), "bf16 masked-tile mismatch"

    print("KERNEL_OK")
</pallas_src>

<mosaic_0001>
module attributes {stable_mosaic.version = 11 : i64} {
  func.func @_pass1_kernel(%arg0: i32, %arg1: i32, %arg2: i32, %arg3: memref<1x8x128xf32, #tpu.memory_space<vmem>>, %arg4: memref<24x8xbf16, #tpu.memory_space<vmem>>, %arg5: memref<8x1xf32, #tpu.memory_space<vmem>>, %arg6: memref<8x1xf32, #tpu.memory_space<vmem>>, %arg7: memref<1x8x8xf32, #tpu.memory_space<vmem>>, %arg8: memref<1x8x128xbf16, #tpu.memory_space<vmem>>, %arg9: memref<8x1xf32, #tpu.memory_space<vmem>>, %arg10: memref<8x1xf32, #tpu.memory_space<vmem>>, %arg11: memref<8x8xf32, #tpu.memory_space<vmem>>) attributes {dimension_semantics = [#tpu.dimension_semantics<parallel>, #tpu.dimension_semantics<arbitrary>, #tpu.dimension_semantics<arbitrary>], iteration_bounds = array<i64: 2, 1, 2>, scalar_prefetch = 0 : i64, scratch_operands = 3 : i64, tpu.core_type = #tpu.core_type<tc>, window_params = [{transform_indices = @transform_0, window_bounds = array<i64: 1, 8, 128>}, {pipeline_mode = #tpu.pipeline_mode<synchronous>, transform_indices = @transform_1, window_bounds = array<i64: 24, 8>}, {pipeline_mode = #tpu.pipeline_mode<synchronous>, transform_indices = @transform_2, window_bounds = array<i64: 8, 1>}, {pipeline_mode = #tpu.pipeline_mode<synchronous>, transform_indices = @transform_3, window_bounds = array<i64: 8, 1>}, {transform_indices = @transform_4, window_bounds = array<i64: 1, 8, 8>}, {transform_indices = @transform_5, window_bounds = array<i64: 1, 8, 128>}]} {
    %c0_i32 = arith.constant 0 : i32
    %0 = arith.cmpi eq, %arg1, %c0_i32 : i32
    %c0_i32_0 = arith.constant 0 : i32
    %1 = arith.cmpi eq, %arg2, %c0_i32_0 : i32
    %2 = arith.andi %0, %1 : i1
    %3 = arith.extui %2 : i1 to i32
    %c0_i32_1 = arith.constant 0 : i32
    %4 = arith.cmpi ne, %3, %c0_i32_1 : i32
    scf.if %4 {
      %cst_32 = arith.constant 0xFF800000 : f32
      %61 = vector.broadcast %cst_32 : f32 to vector<8x1xf32>
      %c0_33 = arith.constant 0 : index
      %c0_34 = arith.constant 0 : index
      %62 = vector.load %arg9[%c0_33, %c0_34] : memref<8x1xf32, #tpu.memory_space<vmem>>, vector<8x1xf32>
      tpu.vector_store %arg9[%c0_33, %c0_34], %61 {strides = array<i32>} : memref<8x1xf32, #tpu.memory_space<vmem>>, vector<8x1xf32>,
      %cst_35 = arith.constant 0.000000e+00 : f32
      %63 = vector.broadcast %cst_35 : f32 to vector<8x1xf32>
      %c0_36 = arith.constant 0 : index
      %c0_37 = arith.constant 0 : index
      %64 = vector.load %arg10[%c0_36, %c0_37] : memref<8x1xf32, #tpu.memory_space<vmem>>, vector<8x1xf32>
      tpu.vector_store %arg10[%c0_36, %c0_37], %63 {strides = array<i32>} : memref<8x1xf32, #tpu.memory_space<vmem>>, vector<8x1xf32>,
      %cst_38 = arith.constant 0.000000e+00 : f32
      %65 = vector.broadcast %cst_38 : f32 to vector<8x8xf32>
      %c0_39 = arith.constant 0 : index
      %c0_40 = arith.constant 0 : index
      %66 = vector.load %arg11[%c0_39, %c0_40] : memref<8x8xf32, #tpu.memory_space<vmem>>, vector<8x8xf32>
      tpu.vector_store %arg11[%c0_39, %c0_40], %65 {strides = array<i32>} : memref<8x8xf32, #tpu.memory_space<vmem>>, vector<8x8xf32>,
    } else {
    }
    %c0 = arith.constant 0 : index
    %c0_2 = arith.constant 0 : index
    %c0_3 = arith.constant 0 : index
    %5 = vector.load %arg3[%c0, %c0_2, %c0_3] : memref<1x8x128xf32, #tpu.memory_space<vmem>>, vector<1x8x128xf32>
    %6 = vector.shape_cast %5 : vector<1x8x128xf32> to vector<8x128xf32>
    %7 = arith.truncf %6 : vector<8x128xf32> to vector<8x128xbf16>
    %c0_4 = arith.constant 0 : index
    %c0_5 = arith.constant 0 : index
    %8 = vector.load %arg4[%c0_4, %c0_5] : memref<24x8xbf16, #tpu.memory_space<vmem>>, vector<24x8xbf16>
    %cst = arith.constant dense<0.000000e+00> : vector<24x128xf32>
    %9 = tpu.matmul %8, %7, %cst {dimension_numbers = #tpu.dot_dimension_numbers<[1], [0], [0], [1], [0, 0, 1, 1], [], []>} : vector<24x8xbf16>, vector<8x128xbf16>, vector<24x128xf32> -> vector<24x128xf32>
    %10 = vector.extract_strided_slice %9 {offsets = [0, 0], sizes = [8, 128], strides = [1, 1]} : vector<24x128xf32> to vector<8x128xf32>
    %11 = vector.extract_strided_slice %9 {offsets = [8, 0], sizes = [8, 128], strides = [1, 1]} : vector<24x128xf32> to vector<8x128xf32>
    %12 = vector.extract_strided_slice %9 {offsets = [16, 0], sizes = [8, 128], strides = [1, 1]} : vector<24x128xf32> to vector<8x128xf32>
    %c0_6 = arith.constant 0 : index
    %c0_7 = arith.constant 0 : index
    %13 = vector.load %arg6[%c0_6, %c0_7] : memref<8x1xf32, #tpu.memory_space<vmem>>, vector<8x1xf32>
    %14 = vector.broadcast %13 : vector<8x1xf32> to vector<8x128xf32>
    %15 = arith.addf %12, %14 : vector<8x128xf32>
    %c0_8 = arith.constant 0 : index
    %c0_9 = arith.constant 0 : index
    %16 = vector.load %arg9[%c0_8, %c0_9] : memref<8x1xf32, #tpu.memory_space<vmem>>, vector<8x1xf32>
    %cst_10 = arith.constant dense<0xFF800000> : vector<8xf32>
    %17 = vector.multi_reduction <maximumf>, %11, %cst_10 [1] : vector<8x128xf32> to vector<8xf32>
    %18 = vector.shape_cast %17 : vector<8xf32> to vector<8x1xf32>
    %19 = arith.maximumf %16, %18 : vector<8x1xf32>
    %c0_11 = arith.constant 0 : index
    %c0_12 = arith.constant 0 : index
    %20 = vector.load %arg9[%c0_11, %c0_12] : memref<8x1xf32, #tpu.memory_space<vmem>>, vector<8x1xf32>
    %21 = arith.subf %20, %19 : vector<8x1xf32>
    %22 = math.exp %21 : vector<8x1xf32>
    %23 = vector.broadcast %19 : vector<8x1xf32> to vector<8x128xf32>
    %24 = arith.subf %11, %23 : vector<8x128xf32>
    %25 = math.exp %24 : vector<8x128xf32>
    %c0_13 = arith.constant 0 : index
    %c0_14 = arith.constant 0 : index
    %26 = vector.load %arg10[%c0_13, %c0_14] : memref<8x1xf32, #tpu.memory_space<vmem>>, vector<8x1xf32>
    %27 = arith.mulf %26, %22 : vector<8x1xf32>
    %cst_15 = arith.constant dense<0.000000e+00> : vector<8xf32>
    %28 = vector.multi_reduction <add>, %25, %cst_15 [1] : vector<8x128xf32> to vector<8xf32>
    %29 = vector.shape_cast %28 : vector<8xf32> to vector<8x1xf32>
    %30 = arith.addf %27, %29 : vector<8x1xf32>
    %c0_16 = arith.constant 0 : index
    %c0_17 = arith.constant 0 : index
    %31 = vector.load %arg10[%c0_16, %c0_17] : memref<8x1xf32, #tpu.memory_space<vmem>>, vector<8x1xf32>
    tpu.vector_store %arg10[%c0_16, %c0_17], %30 {strides = array<i32>} : memref<8x1xf32, #tpu.memory_space<vmem>>, vector<8x1xf32>,
    %c0_18 = arith.constant 0 : index
    %c0_19 = arith.constant 0 : index
    %32 = vector.load %arg11[%c0_18, %c0_19] : memref<8x8xf32, #tpu.memory_space<vmem>>, vector<8x8xf32>
    %33 = tpu.transpose %22, [1, 0] : vector<8x1xf32> -> vector<1x8xf32>
    %34 = vector.broadcast %33 : vector<1x8xf32> to vector<8x8xf32>
    %35 = arith.mulf %32, %34 : vector<8x8xf32>
    %36 = arith.truncf %10 : vector<8x128xf32> to vector<8x128xbf16>
    %37 = arith.truncf %25 : vector<8x128xf32> to vector<8x128xbf16>
    %cst_20 = arith.constant dense<0.000000e+00> : vector<8x8xf32>
    %38 = tpu.matmul %36, %37, %cst_20 {dimension_numbers = #tpu.dot_dimension_numbers<[1], [1], [0], [0], [0, 0, 1, 0], [], []>} : vector<8x128xbf16>, vector<8x128xbf16>, vector<8x8xf32> -> vector<8x8xf32>
    %39 = arith.addf %35, %38 : vector<8x8xf32>
    %c0_21 = arith.constant 0 : index
    %c0_22 = arith.constant 0 : index
    %40 = vector.load %arg11[%c0_21, %c0_22] : memref<8x8xf32, #tpu.memory_space<vmem>>, vector<8x8xf32>
    tpu.vector_store %arg11[%c0_21, %c0_22], %39 {strides = array<i32>} : memref<8x8xf32, #tpu.memory_space<vmem>>, vector<8x8xf32>,
    %c0_23 = arith.constant 0 : index
    %c0_24 = arith.constant 0 : index
    %41 = vector.load %arg9[%c0_23, %c0_24] : memref<8x1xf32, #tpu.memory_space<vmem>>, vector<8x1xf32>
    tpu.vector_store %arg9[%c0_23, %c0_24], %19 {strides = array<i32>} : memref<8x1xf32, #tpu.memory_space<vmem>>, vector<8x1xf32>,
    %cst_25 = arith.constant dense<0xFF800000> : vector<128xf32>
    %42 = vector.multi_reduction <maximumf>, %15, %cst_25 [0] : vector<8x128xf32> to vector<128xf32>
    %43 = vector.shape_cast %42 : vector<128xf32> to vector<1x128xf32>
    %44 = vector.broadcast %43 : vector<1x128xf32> to vector<8x128xf32>
    %45 = arith.subf %15, %44 : vector<8x128xf32>
    %46 = math.exp %45 : vector<8x128xf32>
    %cst_26 = arith.constant dense<0.000000e+00> : vector<128xf32>
    %47 = vector.multi_reduction <add>, %46, %cst_26 [0] : vector<8x128xf32> to vector<128xf32>
    %48 = vector.shape_cast %47 : vector<128xf32> to vector<1x128xf32>
    %49 = tpu.reciprocal %48 {approx = true} : vector<1x128xf32> -> vector<1x128xf32>
    %50 = vector.broadcast %49 : vector<1x128xf32> to vector<8x128xf32>
    %51 = arith.mulf %46, %50 : vector<8x128xf32>
    %52 = arith.truncf %51 : vector<8x128xf32> to vector<8x128xbf16>
    %c0_27 = arith.constant 0 : index
    %c0_28 = arith.constant 0 : index
    %c0_29 = arith.constant 0 : index
    %53 = vector.load %arg8[%c0_27, %c0_28, %c0_29] : memref<1x8x128xbf16, #tpu.memory_space<vmem>>, vector<1x8x128xbf16>
    %54 = vector.shape_cast %53 : vector<1x8x128xbf16> to vector<8x128xbf16>
    %55 = vector.shape_cast %52 : vector<8x128xbf16> to vector<1x8x128xbf16>
    tpu.vector_store %arg8[%c0_27, %c0_28, %c0_29], %55 {strides = array<i32>} : memref<1x8x128xbf16, #tpu.memory_space<vmem>>, vector<1x8x128xbf16>,
    %c0_i32_30 = arith.constant 0 : i32
    %56 = arith.cmpi eq, %arg1, %c0_i32_30 : i32
    %c1_i32 = arith.constant 1 : i32
    %57 = arith.cmpi eq, %arg2, %c1_i32 : i32
    %58 = arith.andi %56, %57 : i1
    %59 = arith.extui %58 : i1 to i32
    %c0_i32_31 = arith.constant 0 : i32
    %60 = arith.cmpi ne, %59, %c0_i32_31 : i32
    scf.if %60 {
      %c0_32 = arith.constant 0 : index
      %c0_33 = arith.constant 0 : index
      %61 = vector.load %arg10[%c0_32, %c0_33] : memref<8x1xf32, #tpu.memory_space<vmem>>, vector<8x1xf32>
      %62 = tpu.reciprocal %61 {approx = true} : vector<8x1xf32> -> vector<8x1xf32>
      %c0_34 = arith.constant 0 : index
      %c0_35 = arith.constant 0 : index
      %63 = vector.load %arg11[%c0_34, %c0_35] : memref<8x8xf32, #tpu.memory_space<vmem>>, vector<8x8xf32>
      %64 = tpu.transpose %62, [1, 0] : vector<8x1xf32> -> vector<1x8xf32>
      %65 = vector.broadcast %64 : vector<1x8xf32> to vector<8x8xf32>
      %66 = arith.mulf %63, %65 : vector<8x8xf32>
      %c0_36 = arith.constant 0 : index
      %c0_37 = arith.constant 0 : index
      %67 = vector.load %arg5[%c0_36, %c0_37] : memref<8x1xf32, #tpu.memory_space<vmem>>, vector<8x1xf32>
      %68 = vector.broadcast %67 : vector<8x1xf32> to vector<8x8xf32>
      %69 = arith.addf %66, %68 : vector<8x8xf32>
      %c0_38 = arith.constant 0 : index
      %c0_39 = arith.constant 0 : index
      %c0_40 = arith.constant 0 : index
      %70 = vector.load %arg7[%c0_38, %c0_39, %c0_40] : memref<1x8x8xf32, #tpu.memory_space<vmem>>, vector<1x8x8xf32>
      %71 = vector.shape_cast %70 : vector<1x8x8xf32> to vector<8x8xf32>
      %72 = vector.shape_cast %69 : vector<8x8xf32> to vector<1x8x8xf32>
      tpu.vector_store %arg7[%c0_38, %c0_39, %c0_40], %72 {strides = array<i32>} : memref<1x8x8xf32, #tpu.memory_space<vmem>>, vector<1x8x8xf32>,
    } else {
    }
    return
  }
  func.func @transform_0(%arg0: i32, %arg1: i32, %arg2: i32) -> (i32, i32, i32) {
    %c1_i32 = arith.constant 1 : i32
    %0 = arith.muli %arg0, %c1_i32 : i32
    %1 = arith.addi %0, %arg1 : i32
    %c0_i32 = arith.constant 0 : i32
    %c0_i32_0 = arith.constant 0 : i32
    return %1, %c0_i32, %arg2 : i32, i32, i32
  }
  func.func @transform_1(%arg0: i32, %arg1: i32, %arg2: i32) -> (i32, i32) {
    %c0_i32 = arith.constant 0 : i32
    %c0_i32_0 = arith.constant 0 : i32
    %c0_i32_1 = arith.constant 0 : i32
    return %c0_i32, %c0_i32_0 : i32, i32
  }
  func.func @transform_2(%arg0: i32, %arg1: i32, %arg2: i32) -> (i32, i32) {
    %c0_i32 = arith.constant 0 : i32
    %c0_i32_0 = arith.constant 0 : i32
    %c0_i32_1 = arith.constant 0 : i32
    return %c0_i32, %c0_i32_0 : i32, i32
  }
  func.func @transform_3(%arg0: i32, %arg1: i32, %arg2: i32) -> (i32, i32) {
    %c0_i32 = arith.constant 0 : i32
    %c0_i32_0 = arith.constant 0 : i32
    %c0_i32_1 = arith.constant 0 : i32
    return %c0_i32, %c0_i32_0 : i32, i32
  }
  func.func @transform_4(%arg0: i32, %arg1: i32, %arg2: i32) -> (i32, i32, i32) {
    %c0_i32 = arith.constant 0 : i32
    %c0_i32_0 = arith.constant 0 : i32
    %c0_i32_1 = arith.constant 0 : i32
    return %arg0, %c0_i32, %c0_i32_0 : i32, i32, i32
  }
  func.func @transform_5(%arg0: i32, %arg1: i32, %arg2: i32) -> (i32, i32, i32) {
    %c1_i32 = arith.constant 1 : i32
    %0 = arith.muli %arg0, %c1_i32 : i32
    %1 = arith.addi %0, %arg1 : i32
    %c0_i32 = arith.constant 0 : i32
    %c0_i32_0 = arith.constant 0 : i32
    return %1, %c0_i32, %arg2 : i32, i32, i32
  }
}

</mosaic_0001>

<bundles_post_ra>
// kernel: tpu_custom_call.1
= control target key start
LH: loop header
LB: loop body
LE: loop exit
PB: predicated region body
PF: predicated region fallthrough
CT: control target
= control target key end

     0   :  { %s1304_s0 = inlined_call_operand.vmem [shape: f32[2,8,256], index: 0, kind: input, shape index: {}]   ;;  %s1305_s1 = inlined_call_operand.vmem [shape: bf16[24,8], index: 1, kind: input, shape index: {}]   ;;  %s1306_s2 = inlined_call_operand.vmem [shape: f32[8,1], index: 2, kind: input, shape index: {}]   ;;  %s1307_s3 = inlined_call_operand.vmem [shape: f32[8,1], index: 3, kind: input, shape index: {}]   ;;  %s1308_s4 = inlined_call_operand.hbm [shape: f32[2,8,8], index: 4, kind: output, shape index: {0}]   ;;  %s1309_s5 = inlined_call_operand.hbm [shape: bf16[2,8,256], index: 5, kind: output, shape index: {1}]  }
   0x1   :  { %1318 = sst [smem:[#allocation18_spill]] %s1304_s0 }
   0x2   :  { %11 = vsyncpa [#allocation6], 0 }
   0x3   :  { %13 = vsyncpa [#allocation6 + $0x1], 0 }
   0x4   :  { %14 = vsyncpa [#allocation8], 0 }
   0x5   :  { %16 = vsyncpa [#allocation8 + $0x1], 0  ;;  %s1047_s18 = smov 0   ;;  %s1049_s19 = smov 0  }
   0x6   :  { %s1051_s20 = smov 0   ;;  %s1053_s21 = smov 0  }
   0x7   :  { %s1055_s22 = smov 0   ;;  %s1057_s23 = smov 0  }
   0x8   :  { %s1059_s24 = smov 0   ;;  %s1061_s25 = smov 0  }
   0x9   :  { %s1063_s26 = smov 0   ;;  %s1065_s27 = smov 0  }
   0xa   :  { %s1067_s28 = smov 0  }
   0xb LB: > { %1319 = sst [smem:[#allocation11_spill]] %s987_s23  ;;  %s693_s29 = sadd.s32 4294967295, %s1007_s28   ;;  %s1007_s28 = sphi %s1067_s28, %s22_s28   ;;  %s1003_s27 = sphi %s1065_s27, %s1343_s27   ;;  %s999_s26 = sphi %s1063_s26, %s1342_s26   ;;  %s995_s25 = sphi %s1061_s25, %s1341_s25   ;;  %s991_s24 = sphi %s1059_s24, %s1340_s24   ;;  %s987_s23 = sphi %s1057_s23, %s1339_s23   ;;  %s983_s22 = sphi %s1055_s22, %s1348_s22   ;;  %s979_s21 = sphi %s1053_s21, %s1347_s21   ;;  %s975_s20 = sphi %s1051_s20, %s1346_s20   ;;  %s971_s19 = sphi %s1049_s19, %s1345_s19   ;;  %s967_s18 = sphi %s1047_s18, %s1344_s18  }
   0xc   : > { %1320 = sst [smem:[#allocation12_spill]] %s999_s26  ;;  %s694_s30 = sadd.s32 4294967294, %s1007_s28  }
   0xd   : > { %1321 = sst [smem:[#allocation13_spill]] %s1003_s27  ;;  %s34_s6 = sadd.s32 1, %s999_s26 }
   0xe   : > { %s41_s7 = sadd.s32 1, %s1003_s27  ;;  %p35_p0 = scmp.ge.s32.totalorder %s34_s6, 2 }
   0xf   : > { %s141_s8 = sadd.s32 1, %s987_s23  ;;  %p151_p1 = scmp.ne.s32.totalorder %s987_s23, %s983_s22 }
  0x10   : > { %p1109_p2 = scmp.eq.s32.totalorder %s693_s29, 3  ;;  %s1350_s6 = smov (%p35_p0, %s34_s6), 0 }
  0x11   : > { %1323 = sst [smem:[#allocation14_spill]] %s1350_s6  ;;  %s1352_s7 = smov (!%p35_p0, %s41_s7), %s1003_s27 }
  0x12   : > { %p1118_p3 = por %p1109_p2, %p151_p1  ;;  %p157_p4 = scmp.ne.s32.totalorder %s983_s22, %s979_s21 }
  0x13   : > { %p43_p5 = scmp.ge.s32.totalorder %s1352_s7, 2  ;;  %p1124_p6 = scmp.eq.s32.totalorder %s694_s30, 3 }
  0x14   : > { %s167_s12 = ssub.s32 %s999_s26, %s1350_s6  ;;  %s171_s13 = sadd.s32 1, %s975_s20 }
  0x15   : > { %s1354_s7 = smov (%p43_p5, %s1352_s7), 0  ;;  %p1135_p7 = por %p1124_p6, %p157_p4 }
  0x16   : > { %1326 = sst [smem:[#allocation15_spill]] %s1354_s7  ;;  %p181_p8 = scmp.ne.s32.totalorder %s975_s20, %s971_s19 }
  0x17   : > { %s138_s15 = ssub.s32 %s1003_s27, %s1354_s7  ;;  %p187_p9 = scmp.ne.s32.totalorder %s971_s19, %s967_s18 }
  0x18   : > { %p139_p10 = scmp.eq.s32.totalorder %s138_s15, 0  ;;  %s168_s16 = sor.u32 %s167_s12, %s138_s15 }
  0x19   : > { %p169_p11 = scmp.eq.s32.totalorder %s168_s16, 0  ;;  %p1147_p12 = por %p181_p8, %p1109_p2 }
  0x1a   : > { %s1152_s29 = scalar_select %p139_p10, %s987_s23, %s141_s8  }
  0x1b   : > { %s1155_s30 = scalar_select %p169_p11, %s975_s20, %s171_s13  }
  0x1c   : > { %1329 = sst [smem:[#allocation16_spill]] %s1152_s29  ;;  %p1159_p13 = por %p187_p9, %p1124_p6 }
  0x1d   : > { %1330 = sst [smem:[#allocation17_spill]] %s1155_s30  ;;  %p697_p0 = scmp.ge.s32.totalorder %s1007_s28, 1 }
  0x1e   : > { %s1331_s6 = scalar_select %p1159_p13, 1, 0 }
  0x1f   : > { %p228_p1 = scmp.lt.s32.totalorder %s1007_s28, 5 }
  0x21   : > { %p229_p4 = pnand %p697_p0, %p228_p1 }
  0x22   : > { %s1315_s8 = sand.u32 (!%p229_p4), 1, %s983_s22   ;;  %s1316_s9 = sand.u32 (!%p229_p4), 1, %s971_s19  }
  0x23   : > { %232 = sbr.rel (%p229_p4) target bundleno = 910 (0x38e), region = 36  ;;  %s1169_s11 = sshll.u32 (!%p229_p4), %s1315_s8, 3 }
  0x24   : > { %s1173_s12 = sshll.u32 (!%p229_p4), %s1316_s9, 2  ;;  %p266_p2 = scmp.lt.s32.totalorder (!%p229_p4), %s995_s25, 1 }
  0x25   : > { %p268_p5 = scmp.lt.s32.totalorder (!%p229_p4), %s991_s24, 1  ;;  %p278_p6 = scmp.eq.s32.totalorder (!%p229_p4), %s991_s24, 0 }
  0x26   : > { %s1332_s0 = sld [smem:[#allocation18_spill]] (!%p229_p4)  ;;  %s257_s30 = scalar_lea.vmem (!%p229_p4), [#allocation5], %s1169_s11 }
  0x27   : > { %s1317_s8 = scalar_lea.vmem (!%p229_p4), [#allocation7], %s1173_s12 }
  0x2a   : > { %s267_s13 = scalar_select %p266_p2, %s995_s25, 1 }
  0x2b   : > { %s269_s15 = scalar_select %p268_p5, %s991_s24, 1 }
  0x2c   : > { %s700_s16 = sshll.u32 %s267_s13, 1  ;;  %282 = sbr.rel (!%p278_p6) target bundleno = 51 (0x33), region = 40  ;;  %vm283_vm0 = vcmask (%p278_p6), 7168   ;;  %vm286_vm1 = vcmask (%p278_p6), 64512   ;;  %v1009_v0 = vmov (%p278_p6), -inf   ;;  %v1010_v1 = vmov (%p278_p6), 0.0  }
  0x2d   : > { %s271_s7 = sadd.s32 %s700_s16, %s269_s15  ;;  %284 = vst.msk [vmem:[#allocation2] sm:$0xff] (%p278_p6), %vm283_vm0, %v1009_v0  ;;  %285 = vst.msk [vmem:[#allocation3] sm:$0xff] (%p278_p6), %vm283_vm0, %v1010_v1 }
  0x2e   : > { %s701_s27 = sshll.u32 %s271_s7, 3  ;;  %287 = vst.msk [vmem:[#allocation4] sm:$0xff] (%p278_p6), %vm286_vm1, %v1010_v1 }
  0x2f   : > { %s273_s23 = scalar_lea.vmem %s1332_s0, %s701_s27 }
  0x33 PF: > { %v288_v2 = vld [vmem:[%s273_s23] sm:$0xff]  ;;  %vm308_vm2 = vcmask 1043456   ;;  %vm301_vm3 = vcmask 64512   ;;  %v845_v7 = vld [vmem:[%s1305_s1 + $0x8] ss:$0 sps:$4 sm:$0xff]   ;;  %v1011_v8 = vmov 0   ;;  %v422_v50 = vlaneseq }
  0x34   : > { %v289_v3 = vpack.c.bf16 %v288_v2, %v288_v2  ;;  %v844_v4 = vld [vmem:[%s1305_s1] sm:$0xff]   ;;  %843 = vset.pattern.permute.xlu1 %v1011_v8  ;;  %842 = vset.pattern.permute.xlu0 %v1011_v8  ;;  %vm387_vm4 = vcmask 7168   ;;  %v1012_v37 = vmov 0.0   ;;  %vm1013_vm5 = vmmov 0   ;;  %p491_p8 = scmp.eq.s32.totalorder %s991_s24, 1  ;;  %v382_v46 = vld [vmem:[#allocation3] sm:$0xff] }
  0x35   : > { %v360_v5 = vld [vmem:[%s1307_s3] sm:$0xff]  ;;  %724 = vmatprep.mubr.msk.bf16.mxu0 %vm301_vm3, %v844_v4  ;;  %728 = vmatprep.subr.bf16.mxu1 %v1012_v37  ;;  %v423_v51 = vshrl.u32 %v422_v50, 7  ;;  %v389_v55 = vld [vmem:[#allocation4] sm:$0xff]  ;;  %v1014_v63 = vmov (%p491_p8), 0  }
  0x36   : > { %734 = vmatprep.subr.msk.bf16.mxu0 %vm308_vm2, %v289_v3  ;;  %v310_v6 = vsel %vm308_vm2, %v289_v3, 0  ;;  %363 = vperm.xlu1 %843, %v360_v5   ;;  %v367_v33 = vld [vmem:[#allocation2] sm:$0xff] }
  0x37   : > { %723 = vmatpush3.bf16.msra.mxu0 %v310_v6  ;;  %730 = vmatprep.mubr.msk.bf16.mxu1 %vm1013_vm5, %v1012_v37  ;;  %v424_v52 = vsub.s32 0, %v423_v51  ;;  %v536_v62 = vld [vmem:[%s1306_s2] sm:$0xff] (%p491_p8) }
  0x3a   : > { %725 = vmatmul.mubr.msk.bf16.vlgmr.msra.gmra.mrb[0].mxu0 %vm301_vm3, %v845_v7 }
  0xb5   : > { %v364_v9 = vpop.permute.xlu1 %363 }
 0x10d   : > { %v726_v10 = vpop.f32.mrb[0].mxu0 }
 0x10e   : > { %v366_v11 = vadd.f32 %v726_v10, %v364_v9  ;;  %v346_v12 = vpop.f32.mrb[1].mxu0 }
 0x10f   : > { %v727_v13 = vpop.f32.mrb[2].mxu0  ;;  %v427_v43 = vpack.c.bf16 %v346_v12, %v346_v12 }
 0x110   : > { %v472_v14 = vrot.slane %v366_v11, 4  ;;  %v349_v15 = vpop.f32.mrb[3].mxu0 }
 0x111   : > { %368 = vmax.xlane.f32.xlu0 %v349_v15 }
 0x112   : > { %v473_v16 = vmax.f32 %v366_v11, %v472_v14 }
 0x114   : > { %v474_v17 = vrot.slane %v473_v16, 2 }
 0x116   : > { %v475_v18 = vmax.f32 %v473_v16, %v474_v17 }
 0x118   : > { %v476_v19 = vrot.slane %v475_v18, 1 }
 0x11a   : > { %v477_v20 = vmax.f32 %v475_v18, %v476_v19 }
 0x11c   : > { %v478_v21 = vsub.f32 %v366_v11, %v477_v20 }
 0x11e   : > { %v479_v22 = vmul.f32 1.442695, %v478_v21 }
 0x120   : > { %846 = vpow2.f32 %v479_v22 }
 0x12a   : > { %v847_v23 = vpop.eup %846 }
 0x12b   : > { %v481_v24 = vrot.slane %v847_v23, 4 }
 0x12d   : > { %v482_v25 = vadd.f32 %v847_v23, %v481_v24 }
 0x12f   : > { %v483_v26 = vrot.slane %v482_v25, 2 }
 0x131   : > { %v484_v27 = vadd.f32 %v483_v26, %v482_v25 }
 0x133   : > { %v485_v28 = vrot.slane %v484_v27, 1 }
 0x135   : > { %v486_v29 = vadd.f32 %v485_v28, %v484_v27 }
 0x137   : > { %848 = vrcp.f32 %v486_v29 }
 0x141   : > { %v849_v30 = vpop.eup %848 }
 0x142   : > { %v488_v31 = vmul.f32 %v849_v30, %v847_v23 }
 0x144   : > { %v489_v32 = vpack.c.bf16 %v488_v31, %v488_v31 }
 0x146   : > { %490 = vst [vmem:[%s1317_s8] sm:$0xf] %v489_v32 }
 0x19e   : > { %v369_v34 = vpop.xlane.xlu0 %368 }
 0x19f   : > { %v370_v35 = vmax.f32 %v367_v33, %v369_v34 }
 0x1a1   : > { %v371_v36 = vsub.f32 %v367_v33, %v370_v35  ;;  %471 = vst.msk [vmem:[#allocation2] sm:$0xff] %vm387_vm4, %v370_v35  ;;  %376 = vperm.xlu0 %842, %v370_v35  }
 0x1a3   : > { %v372_v44 = vmul.f32 1.442695, %v371_v36 }
 0x1a5   : > { %854 = vset.pattern.permute.xlu0 (%p491_p8), %v1014_v63 }
 0x1a6   : > { %539 = vperm.xlu0 (%p491_p8), %854, %v536_v62  }
 0x220   : > { %v377_v38 = vpop.permute.xlu0 %376 }
 0x221   : > { %v379_v39 = vsub.f32 %v349_v15, %v377_v38 }
 0x223   : > { %v380_v40 = vmul.f32 1.442695, %v379_v39 }
 0x225   : > { %850 = vpow2.f32 %v380_v40  ;;  %v540_v2 = vpop.permute.xlu0 (%p491_p8), %539 }
 0x226   : > { %852 = vpow2.f32 %v372_v44 }
 0x22f   : > { %v851_v41 = vpop.eup %850 }
 0x230   : > { %384 = vadd.xlane.f32.xlu1 %v851_v41  ;;  %v428_v42 = vpack.c.bf16 %v851_v41, %v851_v41  ;;  %v853_v45 = vpop.eup %852 }
 0x231   : > { %v383_v47 = vmul.f32 %v853_v45, %v382_v46 }
 0x232   : > { %729 = vmatpush3.bf16.xpose.msra.mxu1 %v428_v42 }
 0x239   : > { %731 = vmatmul.mubr.bf16.vlgmr.msra.gmra.mrb[0].mxu1 %v427_v43 }
 0x263   : > { %390 = vxpose.xlu1.b32.start.end [1/1] (short) (narrow) %v853_v45, 8 }
 0x2bd   : > { %v385_v48 = vpop.xlane.xlu1 %384 }
 0x2be   : > { %v386_v49 = vadd.f32 %v385_v48, %v383_v47 }
 0x2c0   : > { %388 = vst.msk [vmem:[#allocation3] sm:$0xff] %vm387_vm4, %v386_v49 }
 0x2c7   : > { %v496_v0 = vld [vmem:[#allocation3] sm:$0xff] (%p491_p8) }
 0x2c8   : > { %855 = vrcp.f32 (%p491_p8), %v496_v0 }
 0x2d2   : > { %v856_v1 = vpop.eup (%p491_p8), %855 }
 0x2d3   : > { %499 = vxpose.xlu0.b32.start.end [1/1] (short) (narrow) (%p491_p8), %v856_v1, 8 }
 0x2e3   : > { %v406_v53 = vpop.trf.xlu1 }
 0x2e4   : > { %v425_v54 = vrot.slane %v406_v53, %v424_v52 }
 0x2e6   : > { %v426_v56 = vmul.f32 %v425_v54, %v389_v55 }
 0x309   : > { %495 = sbr.rel (!%p491_p8) target bundleno = 859 (0x35b), region = 44 }
 0x30c   : > { %v463_v57 = vpop.f32.mrb[0].mxu1 }
 0x30d   : > { %v469_v58 = vadd.f32 %v463_v57, %v426_v56  ;;  %v732_v59 = vpop.f32.mrb[1].mxu1 }
 0x30e   : > { %v466_v60 = vpop.f32.mrb[2].mxu1 }
 0x30f   : > { %470 = vst.msk [vmem:[#allocation4] sm:$0xff] %vm301_vm3, %v469_v58  ;;  %v733_v61 = vpop.f32.mrb[3].mxu1 }
 0x316   : > { %v498_v3 = vld [vmem:[#allocation4] sm:$0xff] }
 0x353   : > { %v515_v4 = vpop.trf.xlu0 }
 0x354   : > { %v534_v5 = vrot.slane %v515_v4, %v424_v52 }
 0x356   : > { %v535_v6 = vmul.f32 %v534_v5, %v498_v3 }
 0x358   : > { %v542_v7 = vadd.f32 %v540_v2, %v535_v6 }
 0x35a   : > { %543 = vst.msk [vmem:[%s257_s30] sm:$0xff] %vm301_vm3, %v542_v7 }
 0x35b PF: > { %s710_s13 = sshll.u32 %s995_s25, 7  ;;  %s563_s29 = sshll.u32 %s257_s30, 4  ;;  %s564_s29 = int_to_ptr.vmem [resolvable:$true] %s563_s29 }
 0x35c   : > { %s1214_s27 = scalar_lea.hbm %s1308_s4, %s710_s13  ;;  %s1333_s15 = sand.u32 1, %s983_s22  }
 0x35d   : > { %s545_s23 = scalar_lea.sflag [#allocation6], %s1333_s15  ;;  %s857_s16 = scalar_lea.vmem %s564_s29, 128 }
 0x35e   : > { %p858_p9 = scmp.ne.s32.totalorder %s564_s29, %s857_s16  ;;  %s1015_s9 = smov [#allocation5]  }
 0x35f   : > { %s861_s8 = sshll.u32 %s1015_s9, 4  ;;  %s862_s8 = int_to_ptr.vmem [resolvable:$false] %s861_s8 }
 0x360   : > { %p859_p10 = pnand %p858_p9, %p1118_p3  ;;  %s863_s0 = scalar_lea.vmem %s862_s8, 256 }
 0x361   : > { %p864_p0 = scmp.lt.s32.totalorder %s564_s29, %s862_s8  ;;  %p865_p1 = scmp.lt.s32.totalorder %s863_s0, %s857_s16 }
 0x362   : > { %p860_p11 = pneg %p859_p10 }
 0x363   : > { %p866_p4 = por %p865_p1, %p864_p0 }
 0x365   : > { %p867_p2 = pnand %p866_p4, %p860_p11 }
 0x367   : > { %870 = shalt.err (!%p867_p2)
}
 0x368   : > { %s871_s30 = scalar_lea.hbm %s1214_s27, 128  ;;  %s875_s9 = scalar_lea.hbm %s1308_s4, 256 }
 0x369   : > { %p872_p5 = scmp.ne.s32.totalorder %s1214_s27, %s871_s30  ;;  %p876_p9 = scmp.lt.u32.totalorder %s1214_s27, %s1308_s4 }
 0x36a   : > { %p877_p10 = scmp.lt.u32.totalorder %s875_s9, %s871_s30  ;;  %p879_p0 = scmp.lt.u32.totalorder %s871_s30, %s1214_s27 }
 0x36b   : > { %p873_p6 = pnand %p872_p5, %p1118_p3 }
 0x36c   : > { %p878_p11 = por %p877_p10, %p876_p9 }
 0x36d   : > { %p874_p8 = pneg %p873_p6 }
 0x36e   : > { %p880_p1 = por %p879_p0, %p878_p11 }
 0x370   : > { %p881_p4 = pnand %p880_p1, %p874_p8 }
 0x372   : > { %884 = shalt.err (!%p881_p4)
}
 0x373   : > { %735 = dma.vmem_to_hbm [thread:$0]  (%p1118_p3), %s564_s29, 128, %s1214_s27, %s545_s23  }
 0x374   : > { %s711_s0 = sshll.u32 %s995_s25, 1  ;;  %s1334_s26 = scalar_lea.vmem [#allocation7], %s1173_s12 }
 0x375   : > { %s579_s15 = sshll.u32 %s1334_s26, 4  ;;  %s575_s16 = sadd.s32 %s991_s24, %s711_s0  ;;  %s1241_s15 = int_to_ptr.vmem [resolvable:$true] %s579_s15 }
 0x376   : > { %s712_s30 = sshll.u32 %s575_s16, 6  ;;  %s1335_s9 = sand.u32 1, %s971_s19  }
 0x377   : > { %s577_s10 = scalar_lea.hbm %s1309_s5, %s712_s30  ;;  %s550_s7 = scalar_lea.sflag [#allocation8], %s1335_s9 }
 0x378   : > { %s885_s8 = scalar_lea.vmem %s1241_s15, 64  ;;  %s1016_s25 = smov [#allocation7]  }
 0x379   : > { %p886_p2 = scmp.ne.s32.totalorder %s1241_s15, %s885_s8  ;;  %s889_s12 = sshll.u32 %s1016_s25, 4  ;;  %s890_s12 = int_to_ptr.vmem [resolvable:$false] %s889_s12 }
 0x37a   : > { %s891_s24 = scalar_lea.vmem %s890_s12, 128  ;;  %p892_p6 = scmp.lt.s32.totalorder %s1241_s15, %s890_s12 }
 0x37b   : > { %p887_p3 = pnand %p886_p2, %p1147_p12  ;;  %p893_p8 = scmp.lt.s32.totalorder %s891_s24, %s885_s8 }
 0x37d   : > { %p888_p5 = pneg %p887_p3  ;;  %p894_p9 = por %p893_p8, %p892_p6 }
 0x37f   : > { %p895_p10 = pnand %p894_p9, %p888_p5 }
 0x381   : > { %898 = shalt.err (!%p895_p10)
}
 0x382   : > { %s899_s27 = scalar_lea.hbm %s577_s10, 64  ;;  %s903_s0 = scalar_lea.hbm %s1309_s5, 256 }
 0x383   : > { %p900_p11 = scmp.ne.s32.totalorder %s577_s10, %s899_s27  ;;  %p904_p4 = scmp.lt.u32.totalorder %s577_s10, %s1309_s5 }
 0x384   : > { %p905_p2 = scmp.lt.u32.totalorder %s903_s0, %s899_s27  ;;  %p907_p13 = scmp.lt.u32.totalorder %s899_s27, %s577_s10 }
 0x385   : > { %p901_p0 = pnand %p900_p11, %p1147_p12 }
 0x386   : > { %p906_p3 = por %p905_p2, %p904_p4 }
 0x387   : > { %p902_p1 = pneg %p901_p0 }
 0x388   : > { %p908_p6 = por %p907_p13, %p906_p3 }
 0x38a   : > { %p909_p5 = pnand %p908_p6, %p902_p1 }
 0x38c   : > { %912 = shalt.err (!%p909_p5)
}
 0x38d   : > { %736 = dma.vmem_to_hbm [thread:$0]  (%p1147_p12), %s1241_s15, 64, %s577_s10, %s550_s7  }
 0x38e PF: > { %p746_p8 = scmp.ge.s32.totalorder %s1007_s28, 2  ;;  %s591_s30 = sand.u32 1, %s979_s21  }
 0x38f   : > { %s592_s11 = scalar_lea.sflag [#allocation6], %s591_s30 }
 0x390   : > { %p740_p9 = pnand %p746_p8, %p1135_p7 }
 0x392   : > { %958 = dma.done.wait (!%p740_p9), %s592_s11, 128  }
 0x393   : > { %960 = vsyncadd (!%p740_p9), %s592_s11, 4294967168  ;;  %s600_s13 = sand.u32 1, %s967_s18   ;;  %p1336_p13 = scmp.ne.s32.totalorder %s1331_s6, 0 }
 0x394   : > { %s601_s9 = scalar_lea.sflag [#allocation8], %s600_s13 }
 0x395   : > { %p743_p10 = pnand %p746_p8, %p1336_p13 }
 0x397   : > { %962 = dma.done.wait (!%p743_p10), %s601_s9, 64  }
 0x398   : > { %964 = vsyncadd (!%p743_p10), %s601_s9, 4294967232  ;;  %s22_s28 = sadd.s32 1, %s1007_s28   ;;  %s1337_s17 = sld [smem:[#allocation17_spill]] }
 0x399   : > { %p19_p12 = scmp.ge.s32.totalorder %s22_s28, 6   ;;  %s1338_s14 = sld [smem:[#allocation11_spill]] }
 0x39a   : > { %s1339_s23 = sld [smem:[#allocation16_spill]]  ;;  %s1340_s24 = sld [smem:[#allocation12_spill]] }
 0x39b   : > { %s1341_s25 = sld [smem:[#allocation13_spill]]  ;;  %s1342_s26 = sld [smem:[#allocation14_spill]] }
 0x39c   : > { %s1343_s27 = sld [smem:[#allocation15_spill]]  ;;  %s1344_s18 = smov %s971_s19 }
 0x39d   : > { %s1345_s19 = smov %s975_s20  ;;  %s1347_s21 = smov %s983_s22 }
 0x39e   : > { %s1346_s20 = smov %s1337_s17  ;;  %21 = sbr.rel (!%p19_p12) target bundleno = 11 (0xb), region = 96 }
 0x39f   : > { %s1348_s22 = smov %s1338_s14 }
 0x3a5   :  { %606 = vsyncpa [#allocation6], 1 }
 0x3a6   :  { %608 = vsyncpa [#allocation6 + $0x1], 1 }
 0x3a7   :  { %609 = vsyncpa [#allocation8], 1 }
 0x3a8   :  { %611 = vsyncpa [#allocation8 + $0x1], 1 }

</bundles_post_ra>
